<compile_context>
chip_gen: v5e
topology: v5e:2x2
jax: 0.10.0
libtpu: 0.0.40
codegen_flags: <defaults>
</compile_context>

<pallas_src>
import functools

import jax
import jax.numpy as jnp
from jax import lax
from jax.experimental import pallas as pl
from jax.experimental.pallas import tpu as pltpu


def qr_embedding_kernel(idx_ref, table_ref, out_ref, *, qr_ratio, qn, group):
    # idx_ref:   (TM, G)       int32  -- G consecutive flat indices per packed row
    # table_ref: (G*V, G*D)           -- block-diagonal replication of [emb_q; emb_r]
    # out_ref:   (TM, G*D)            -- packed row-major output (lane-dense when
    #                                    G*D is a multiple of 128)
    v = qn + qr_ratio
    gv = table_ref.shape[0]
    tm = idx_ref.shape[0]

    idx = idx_ref[...]                                     # (TM, G) int32

    # Quotient / remainder. Power-of-two qr_ratio -> shift + AND; otherwise
    # exact integer division (compiler lowers the constant divisor).
    # Matches torch for x >= 0 (embedding ids); trunc-vs-floor divergence for
    # x < 0 is not guarded, same as the module's practical usage.
    if qr_ratio > 0 and (qr_ratio & (qr_ratio - 1)) == 0:
        q_idx = idx >> (qr_ratio.bit_length() - 1)
        r_idx = idx & (qr_ratio - 1)
    else:
        q_idx = lax.div(idx, jnp.int32(qr_ratio))
        r_idx = idx - q_idx * jnp.int32(qr_ratio)

    # Hit columns inside the packed (G*V)-wide "two-hot" mask:
    #   q-hit for slot g:  g*V + q_idx[:, g]
    #   r-hit for slot g:  g*V + qn + r_idx[:, g]
    slot = lax.broadcasted_iota(jnp.int32, (tm, group), 1) * jnp.int32(v)
    q_col = q_idx + slot                                   # (TM, G)
    r_col = r_idx + slot + jnp.int32(qn)                   # (TM, G)

    cols = lax.broadcasted_iota(jnp.int32, (tm, gv), 1)    # (TM, G*V)
    hit = jnp.zeros((tm, gv), dtype=jnp.bool_)
    for g in range(group):                                 # static unroll, G small
        hit = jnp.logical_or(hit, cols == q_col[:, g:g + 1])
        hit = jnp.logical_or(hit, cols == r_col[:, g:g + 1])
    two_hot = hit.astype(table_ref.dtype)

    # Single MXU matmul against the block-diagonal table yields
    # emb_q[q] + emb_r[r] for all G slots of every packed row, already in
    # lane-dense row-major layout -> one wide unmasked store.
    out_ref[...] = jnp.dot(
        two_hot, table_ref[...], preferred_element_type=jnp.float32
    ).astype(out_ref.dtype)


def qr_embedding_prepare(emb_q, emb_r, *, dtype=None):
    """One-time parameter repack (hoist this out of the per-lookup path).

    Builds the block-diagonal [emb_q; emb_r] table laid out so the kernel emits
    lane-dense, row-major packed output. Optionally cast to bf16
    (dtype=jnp.bfloat16): MXU-native on v5e/v6e/v7x; the lookup stays exact up
    to the one-time table rounding.
    """
    qn, d = (int(s) for s in emb_q.shape)
    qr_ratio = int(emb_r.shape[0])
    cat = jnp.concatenate([emb_q, emb_r], axis=0)          # (V, D)
    if dtype is not None:
        cat = cat.astype(dtype)
    group = 128 // d if (0 < d < 128 and 128 % d == 0) else 1
    if group == 1:
        table = cat
    else:
        # Block-diagonal (G*V, G*D): block g routes slot g's hits to output
        # columns [g*D, (g+1)*D). (G x larger than the raw table; fine until the
        # DMA-gather crossover noted in the TODO.)
        eye = jnp.eye(group, dtype=cat.dtype)
        table = jnp.einsum("gh,vd->gvhd", eye, cat).reshape(
            group * (qn + qr_ratio), group * d)
    return dict(table=table, qn=qn, qr_ratio=qr_ratio, emb_dim=d,
                group=group, out_dtype=emb_q.dtype)


def qr_embedding_apply(x, params, *, tile_n=1024):
    """Pallas QR embedding lookup: emb_q[x // qr_ratio] + emb_r[x % qr_ratio]."""
    table = params["table"]
    qn, qr_ratio = params["qn"], params["qr_ratio"]
    d, group = params["emb_dim"], params["group"]
    out_dtype = params["out_dtype"]
    v = qn + qr_ratio
    assert table.shape == (group * v, group * d), table.shape

    orig_shape = x.shape
    idx = x.reshape(-1).astype(jnp.int32)
    n = idx.shape[0]

    # Packed rows: `group` consecutive lookups per row -> packed width group*d.
    m = pl.cdiv(n, group)                                  # packed rows needed
    tile_m = max(8, (max(tile_n, 128) // group) // 8 * 8)  # ~tile_n ids / step
    if m > 8:
        # Don't tile beyond the problem, and keep >= 2 grid steps so both v7x
        # TensorCores get work (no effect on single-TC v5e/v6e).
        tile_m = min(tile_m, pl.cdiv(pl.cdiv(m, 2), 8) * 8)
    else:
        tile_m = 8
    m_pad = pl.cdiv(m, tile_m) * tile_m
    n_pad = m_pad * group

    idx = jnp.pad(idx, (0, n_pad - n)).reshape(m_pad, group)   # pad ids are 0 (valid)

    # VMEM budget from actual buffers: single-buffered table, double-buffered
    # idx/out tiles, in-kernel mask/result temporaries; 2x + headroom, capped
    # below physical VMEM (64 MiB on v7x, 128 MiB on v5e/v6e).
    def _padded_bytes(rows, cols, itemsize):
        return (pl.cdiv(rows, 8) * 8) * (pl.cdiv(cols, 128) * 128) * itemsize

    est = (_padded_bytes(table.shape[0], table.shape[1], table.dtype.itemsize)
           + 2 * _padded_bytes(tile_m, group, 4)
           + 2 * _padded_bytes(tile_m, group * d, 4)
           + 2 * _padded_bytes(tile_m, group * v, 4))
    try:
        physical_vmem = int(pltpu.get_tpu_info().vmem_capacity_bytes)
    except Exception:
        physical_vmem = 64 * 1024 * 1024                   # conservative (v7x)
    vmem_limit = min(max(2 * est + (4 << 20), 16 << 20),
                     physical_vmem - (8 << 20))

    out = pl.pallas_call(
        functools.partial(qr_embedding_kernel, qr_ratio=qr_ratio, qn=qn,
                          group=group),
        out_shape=jax.ShapeDtypeStruct((m_pad, group * d), out_dtype),
        grid_spec=pltpu.PrefetchScalarGridSpec(
            num_scalar_prefetch=0,
            grid=(m_pad // tile_m,),
            in_specs=[
                pl.BlockSpec((tile_m, group), lambda i: (i, 0)),
                # Grid-invariant resident table: single-buffered (halves its
                # VMEM reservation; matters as the vocab grows).
                pl.BlockSpec(table.shape, lambda i: (0, 0),
                             pipeline_mode=pl.Buffered(1)),
            ],
            out_specs=pl.BlockSpec((tile_m, group * d), lambda i: (i, 0)),
        ),
        compiler_params=pltpu.CompilerParams(
            dimension_semantics=("parallel",),
            vmem_limit_bytes=int(vmem_limit),
        ),
    )(idx, table)

    # Free row-major view back to (N, D): no transpose, only tail padding drops.
    out = out.reshape(n_pad, d)
    if n_pad != n:
        out = out[:n]
    return out.reshape(*orig_shape, d)


def qr_embedding(x, emb_q, emb_r, qr_ratio=None, *, tile_n=1024):
    """Convenience wrapper. In real use, call qr_embedding_prepare() ONCE and
    reuse its result across lookups (the prep is an extra HBM pass per call)."""
    del qr_ratio  # derived from emb_r.shape[0]
    return qr_embedding_apply(x, qr_embedding_prepare(emb_q, emb_r),
                              tile_n=tile_n)


def qr_embedding_ref(x, emb_q, emb_r, qr_ratio):
    xi = x.astype(jnp.int32)
    x_q = xi // qr_ratio          # floor == trunc for x >= 0
    x_r = xi % qr_ratio
    return jnp.take(emb_q, x_q, axis=0) + jnp.take(emb_r, x_r, axis=0)


if __name__ == "__main__":
    # Module config (synthetic, deterministic init — no checkpoint loading).
    feature_num = 40
    emb_dim = 32
    qr_ratio = 4                  # config['qr_ratio']
    emb_std = 0.003               # emb_init = 'normal_0.003'

    key = jax.random.PRNGKey(0)
    k_q, k_r, k_x = jax.random.split(key, 3)

    q_rows = int(feature_num / qr_ratio) + 2
    embedding_q = jax.random.normal(k_q, (q_rows, emb_dim), jnp.float32) * emb_std
    embedding_r = jax.random.normal(k_r, (qr_ratio, emb_dim), jnp.float32) * emb_std

    # Input: integer feature ids, small batch of sequences: [batch=2, fields=8]
    x = jax.random.randint(k_x, (2, 8), 0, feature_num, dtype=jnp.int32)

    params = qr_embedding_prepare(embedding_q, embedding_r)   # hoisted: done once
    out = qr_embedding_apply(x, params)
    out = jax.block_until_ready(out)

    ref = qr_embedding_ref(x, embedding_q, embedding_r, qr_ratio)
    assert out.shape == (2, 8, emb_dim), out.shape
    assert jnp.allclose(out, ref, atol=1e-6, rtol=1e-6), "mismatch vs reference"

    print("KERNEL_OK")
</pallas_src>

<mosaic_0001>
module attributes {stable_mosaic.version = 11 : i64} {
  func.func @qr_embedding_kernel(%arg0: i32, %arg1: memref<8x4xi32, #tpu.memory_space<vmem>>, %arg2: memref<64x128xf32, #tpu.memory_space<vmem>>, %arg3: memref<8x128xf32, #tpu.memory_space<vmem>>) attributes {dimension_semantics = [#tpu.dimension_semantics<parallel>], iteration_bounds = array<i64: 1>, scalar_prefetch = 0 : i64, scratch_operands = 0 : i64, tpu.core_type = #tpu.core_type<tc>, window_params = [{transform_indices = @transform_0, window_bounds = array<i64: 8, 4>}, {pipeline_mode = #tpu.pipeline_mode<synchronous>, transform_indices = @transform_1, window_bounds = array<i64: 64, 128>}, {transform_indices = @transform_2, window_bounds = array<i64: 8, 128>}]} {
    %c0 = arith.constant 0 : index
    %c0_0 = arith.constant 0 : index
    %0 = vector.load %arg1[%c0, %c0_0] : memref<8x4xi32, #tpu.memory_space<vmem>>, vector<8x4xi32>
    %c2_i32 = arith.constant 2 : i32
    %1 = vector.broadcast %c2_i32 : i32 to vector<8x4xi32>
    %2 = arith.shrsi %0, %1 : vector<8x4xi32>
    %c3_i32 = arith.constant 3 : i32
    %3 = vector.broadcast %c3_i32 : i32 to vector<8x4xi32>
    %4 = arith.andi %0, %3 : vector<8x4xi32>
    %5 = tpu.iota {dimensions = array<i32: 1>} : vector<8x4xi32>
    %c16_i32 = arith.constant 16 : i32
    %6 = vector.broadcast %c16_i32 : i32 to vector<8x4xi32>
    %7 = arith.muli %5, %6 : vector<8x4xi32>
    %8 = arith.addi %2, %7 : vector<8x4xi32>
    %9 = arith.addi %4, %7 : vector<8x4xi32>
    %c12_i32 = arith.constant 12 : i32
    %10 = vector.broadcast %c12_i32 : i32 to vector<8x4xi32>
    %11 = arith.addi %9, %10 : vector<8x4xi32>
    %12 = tpu.iota {dimensions = array<i32: 1>} : vector<8x64xi32>
    %false = arith.constant false
    %13 = vector.broadcast %false : i1 to vector<8x64xi1>
    %14 = vector.extract_strided_slice %8 {offsets = [0, 0], sizes = [8, 1], strides = [1, 1]} : vector<8x4xi32> to vector<8x1xi32>
    %15 = vector.broadcast %14 : vector<8x1xi32> to vector<8x64xi32>
    %16 = arith.cmpi eq, %12, %15 : vector<8x64xi32>
    %17 = arith.ori %13, %16 : vector<8x64xi1>
    %18 = vector.extract_strided_slice %11 {offsets = [0, 0], sizes = [8, 1], strides = [1, 1]} : vector<8x4xi32> to vector<8x1xi32>
    %19 = vector.broadcast %18 : vector<8x1xi32> to vector<8x64xi32>
    %20 = arith.cmpi eq, %12, %19 : vector<8x64xi32>
    %21 = arith.ori %17, %20 : vector<8x64xi1>
    %22 = vector.extract_strided_slice %8 {offsets = [0, 1], sizes = [8, 1], strides = [1, 1]} : vector<8x4xi32> to vector<8x1xi32>
    %23 = vector.broadcast %22 : vector<8x1xi32> to vector<8x64xi32>
    %24 = arith.cmpi eq, %12, %23 : vector<8x64xi32>
    %25 = arith.ori %21, %24 : vector<8x64xi1>
    %26 = vector.extract_strided_slice %11 {offsets = [0, 1], sizes = [8, 1], strides = [1, 1]} : vector<8x4xi32> to vector<8x1xi32>
    %27 = vector.broadcast %26 : vector<8x1xi32> to vector<8x64xi32>
    %28 = arith.cmpi eq, %12, %27 : vector<8x64xi32>
    %29 = arith.ori %25, %28 : vector<8x64xi1>
    %30 = vector.extract_strided_slice %8 {offsets = [0, 2], sizes = [8, 1], strides = [1, 1]} : vector<8x4xi32> to vector<8x1xi32>
    %31 = vector.broadcast %30 : vector<8x1xi32> to vector<8x64xi32>
    %32 = arith.cmpi eq, %12, %31 : vector<8x64xi32>
    %33 = arith.ori %29, %32 : vector<8x64xi1>
    %34 = vector.extract_strided_slice %11 {offsets = [0, 2], sizes = [8, 1], strides = [1, 1]} : vector<8x4xi32> to vector<8x1xi32>
    %35 = vector.broadcast %34 : vector<8x1xi32> to vector<8x64xi32>
    %36 = arith.cmpi eq, %12, %35 : vector<8x64xi32>
    %37 = arith.ori %33, %36 : vector<8x64xi1>
    %38 = vector.extract_strided_slice %8 {offsets = [0, 3], sizes = [8, 1], strides = [1, 1]} : vector<8x4xi32> to vector<8x1xi32>
    %39 = vector.broadcast %38 : vector<8x1xi32> to vector<8x64xi32>
    %40 = arith.cmpi eq, %12, %39 : vector<8x64xi32>
    %41 = arith.ori %37, %40 : vector<8x64xi1>
    %42 = vector.extract_strided_slice %11 {offsets = [0, 3], sizes = [8, 1], strides = [1, 1]} : vector<8x4xi32> to vector<8x1xi32>
    %43 = vector.broadcast %42 : vector<8x1xi32> to vector<8x64xi32>
    %44 = arith.cmpi eq, %12, %43 : vector<8x64xi32>
    %45 = arith.ori %41, %44 : vector<8x64xi1>
    %46 = arith.extui %45 : vector<8x64xi1> to vector<8x64xi32>
    %47 = arith.sitofp %46 : vector<8x64xi32> to vector<8x64xf32>
    %c0_1 = arith.constant 0 : index
    %c0_2 = arith.constant 0 : index
    %48 = vector.load %arg2[%c0_1, %c0_2] : memref<64x128xf32, #tpu.memory_space<vmem>>, vector<64x128xf32>
    %cst = arith.constant dense<0.000000e+00> : vector<8x128xf32>
    %49 = tpu.matmul %47, %48, %cst {dimension_numbers = #tpu.dot_dimension_numbers<[1], [0], [0], [1], [0, 0, 1, 1], [], []>} : vector<8x64xf32>, vector<64x128xf32>, vector<8x128xf32> -> vector<8x128xf32>
    %c0_3 = arith.constant 0 : index
    %c0_4 = arith.constant 0 : index
    %50 = vector.load %arg3[%c0_3, %c0_4] : memref<8x128xf32, #tpu.memory_space<vmem>>, vector<8x128xf32>
    tpu.vector_store %arg3[%c0_3, %c0_4], %49 {strides = array<i32>} : memref<8x128xf32, #tpu.memory_space<vmem>>, vector<8x128xf32>,
    return
  }
  func.func @transform_0(%arg0: i32) -> (i32, i32) {
    %c0_i32 = arith.constant 0 : i32
    %c0_i32_0 = arith.constant 0 : i32
    return %arg0, %c0_i32 : i32, i32
  }
  func.func @transform_1(%arg0: i32) -> (i32, i32) {
    %c0_i32 = arith.constant 0 : i32
    %c0_i32_0 = arith.constant 0 : i32
    %c0_i32_1 = arith.constant 0 : i32
    return %c0_i32, %c0_i32_0 : i32, i32
  }
  func.func @transform_2(%arg0: i32) -> (i32, i32) {
    %c0_i32 = arith.constant 0 : i32
    %c0_i32_0 = arith.constant 0 : i32
    return %arg0, %c0_i32 : i32, i32
  }
}

</mosaic_0001>

<bundles_post_ra>
// kernel: tpu_custom_call.1
= control target key start
LH: loop header
LB: loop body
LE: loop exit
PB: predicated region body
PF: predicated region fallthrough
CT: control target
= control target key end

     0   :  { %7 = vsyncpa [#allocation3], 0  ;;  %s229_s0 = inlined_call_operand.vmem [shape: s32[8,4], index: 0, kind: input, shape index: {}]   ;;  %s230_s1 = inlined_call_operand.hbm [shape: f32[64,128], index: 1, kind: input, shape index: {}]   ;;  %s231_s2 = inlined_call_operand.hbm [shape: f32[8,128], index: 2, kind: output, shape index: {}]  }
   0x1   :  { %8 = vsyncpa [#allocation4], 0  ;;  %s15_s11 = sshll.u32 %s230_s1, 4  ;;  %s196_s12 = smov [#allocation2]   ;;  %s16_s11 = int_to_ptr.hbm [resolvable:$true] %s15_s11 }
   0x2   :  { %s17_s13 = sshll.u32 %s196_s12, 4  ;;  %s197_s14 = smov 128   ;;  %s18_s13 = int_to_ptr.vmem [resolvable:$true] %s17_s13 }
   0x3   :  { %s198_s15 = smov 8  }
   0x4   :  { %23 = dma.hbm_to_vmem [thread:$0]  %s16_s11, 1024, %s18_s13, [#allocation3], %s197_s14, %s197_s14, %s198_s15  }
   0x5   :  { %192 = dma.done.wait [#allocation3], 1024  }
   0x6   :  { %193 = vsyncadd [#allocation3], 4294966272  ;;  %v31_v0 = vlaneseq  ;;  %v199_v1 = vmov 1   ;;  %v200_v2 = vmov 0   ;;  %v201_v4 = vmov 2   ;;  %v28_v6 = vld [vmem:[%s229_s0] sm:$0xff] }
   0x7   :  { %140 = vset.pattern.permute.xlu1 %v199_v1  ;;  %139 = vset.pattern.permute.xlu0 %v200_v2  ;;  %v29_v7 = vshra.s32 %v28_v6, 2  ;;  %v30_v8 = vand.u32 3, %v28_v6  ;;  %v202_v12 = vmov 3   ;;  %v85_v13 = vld [vmem:[#allocation2 + $0x38] sm:$0xff]  ;;  %v84_v14 = vld [vmem:[#allocation2 + $0x30] sm:$0xff]  ;;  %v83_v15 = vld [vmem:[#allocation2 + $0x28] sm:$0xff] }
   0x8   :  { %v32_v3 = vand.u32 127, %v31_v0  ;;  %141 = vset.pattern.permute.xlu2 %v201_v4  ;;  %98 = vmatpush.msra.mxu0 %v85_v13  ;;  %v82_v16 = vld [vmem:[#allocation2 + $0x20] sm:$0xff]  ;;  %v81_v17 = vld [vmem:[#allocation2 + $0x18] sm:$0xff]  ;;  %v80_v18 = vld [vmem:[#allocation2 + $0x10] sm:$0xff]  ;;  %vm86_vm14 = vcmask 523264   ;;  %v203_v29 = vmov 0.0  }
   0x9   :  { %v79_v19 = vld [vmem:[#allocation2 + $0x8] sm:$0xff]  ;;  %v78_v20 = vld [vmem:[#allocation2] sm:$0xff]  ;;  %s204_s0 = smov [#allocation5]   ;;  %s118_s20 = sshll.u32 %s231_s2, 4  ;;  %s119_s20 = int_to_ptr.hbm [resolvable:$true] %s118_s20 }
   0xa   :  { %v33_v5 = vmul.u32 16, %v32_v3  ;;  %99 = vmatpush.msra.mxu0 %v84_v14  ;;  %s116_s17 = sshll.u32 %s204_s0, 4  ;;  %s117_s17 = int_to_ptr.vmem [resolvable:$true] %s116_s17 }
   0xc   :  { %v34_v9 = vadd.s32 %v33_v5, %v29_v7  ;;  %v35_v10 = vadd.s32 %v33_v5, %v30_v8  ;;  %100 = vmatpush.msra.mxu0 %v83_v15 }
   0xe   :  { %47 = vperm.xlu1 %140, %v34_v9   ;;  %38 = vperm.xlu0 %139, %v34_v9   ;;  %v36_v11 = vadd.s32 12, %v35_v10 }
   0xf   :  { %57 = vperm.xlu2 %141, %v34_v9   ;;  %101 = vmatpush.msra.mxu0 %v82_v16 }
  0x11   :  { %102 = vmatpush.msra.mxu0 %v81_v17 }
  0x13   :  { %103 = vmatpush.msra.mxu0 %v80_v18 }
  0x15   :  { %104 = vmatpush.msra.mxu0 %v79_v19 }
  0x16   :  { %52 = vperm.xlu1 %140, %v36_v11   ;;  %42 = vperm.xlu0 %139, %v36_v11  }
  0x17   :  { %62 = vperm.xlu2 %141, %v36_v11   ;;  %105 = vmatpush.msra.mxu0 %v78_v20 }
  0x1e   :  { %142 = vset.pattern.permute.xlu0 %v202_v12  ;;  %143 = vset.pattern.permute.xlu1 %v202_v12 }
  0x1f   :  { %67 = vperm.xlu0 %142, %v34_v9   ;;  %72 = vperm.xlu1 %143, %v36_v11  }
  0x69   :  { %v58_v23 = vpop.permute.xlu2 %57 }
  0x6a   :  { %vm59_vm7 = vcmp.eq.s32.totalorder %v32_v3, %v58_v23 }
  0x71   :  { %v63_v26 = vpop.permute.xlu2 %62 }
  0x72   :  { %vm64_vm9 = vcmp.eq.s32.totalorder %v32_v3, %v63_v26 }
  0x80   :  { %v48_v21 = vpop.permute.xlu1 %47  ;;  %v39_v22 = vpop.permute.xlu0 %38 }
  0x81   :  { %vm40_vm0 = vcmp.eq.s32.totalorder %v32_v3, %v39_v22  ;;  %vm49_vm2 = vcmp.eq.s32.totalorder %v32_v3, %v48_v21 }
  0x88   :  { %v53_v24 = vpop.permute.xlu1 %52  ;;  %v43_v25 = vpop.permute.xlu0 %42 }
  0x89   :  { %vm44_vm1 = vcmp.eq.s32.totalorder %v32_v3, %v43_v25  ;;  %vm54_vm4 = vcmp.eq.s32.totalorder %v32_v3, %v53_v24 }
  0x8a   :  { %vm45_vm3 = vmor %vm40_vm0, %vm44_vm1 }
  0x8b   :  { %vm50_vm5 = vmor %vm45_vm3, %vm49_vm2 }
  0x8c   :  { %vm55_vm6 = vmor %vm50_vm5, %vm54_vm4 }
  0x8d   :  { %vm60_vm8 = vmor %vm55_vm6, %vm59_vm7 }
  0x8e   :  { %vm65_vm10 = vmor %vm60_vm8, %vm64_vm9 }
  0x91   :  { %v68_v27 = vpop.permute.xlu0 %67  ;;  %v73_v28 = vpop.permute.xlu1 %72 }
  0x92   :  { %vm69_vm11 = vcmp.eq.s32.totalorder %v32_v3, %v68_v27  ;;  %vm74_vm12 = vcmp.eq.s32.totalorder %v32_v3, %v73_v28 }
  0x93   :  { %vm70_vm13 = vmor %vm65_vm10, %vm69_vm11 }
  0x94   :  { %vm75_vm15 = vmor %vm70_vm13, %vm74_vm12 }
  0x95   :  { %v128_v30 = vsel %vm75_vm15, 1.0, %v203_v29 }
  0x96   :  { %129 = vmatmul.msk.f32.vlgmr.msra.gmra.mxu0 %vm86_vm14, %v128_v30 }
 0x113   :  { %v107_v31 = vpop.f32.mrf.mxu0 }
 0x114   :  { %110 = vst [vmem:[#allocation5] sm:$0xff] %v107_v31 }
 0x115   :  { %121 = dma.vmem_to_hbm [thread:$0]  %s117_s17, 128, %s119_s20, [#allocation4]  }
 0x116   :  { %194 = dma.done.wait [#allocation4], 128  }
 0x117   :  { %195 = vsyncadd [#allocation4], 4294967168 }
 0x118   :  { %126 = vsyncpa [#allocation3], 1 }
 0x119   :  { %127 = vsyncpa [#allocation4], 1 }

</bundles_post_ra>
